<compile_context>
chip_gen: v7x
topology: tpu7x:2x2x1
jax: 0.10.0
libtpu: 0.0.40
codegen_flags: <defaults>
</compile_context>

<pallas_src>
import functools

import jax
import jax.numpy as jnp
import numpy as np
from jax.experimental import pallas as pl
from jax.experimental.pallas import tpu as pltpu

EPS = 1e-5


def _round_up(x, m):
    return ((x + m - 1) // m) * m


def _prelu(x, a):
    return jnp.where(x > 0, x, a * x)


def _masked_layernorm(x, gamma, beta, n_real, mask):
    """LayerNorm over the last axis, counting only the first n_real lanes.

    Padded lanes must be zero on input; gamma/beta are zero there, so padded
    lanes stay exactly zero on output.
    """
    if mask is None:
        mu = jnp.mean(x, axis=-1, keepdims=True)
        d = x - mu
    else:
        mu = jnp.sum(x, axis=-1, keepdims=True) * (1.0 / n_real)
        d = jnp.where(mask, x - mu, 0.0)
    var = jnp.sum(d * d, axis=-1, keepdims=True) * (1.0 / n_real)
    return d * jax.lax.rsqrt(var + EPS) * gamma + beta


def _resmlp_kernel(num_hidden_layers, hidden_real, mm_dtype, *refs):
    """refs order: x, labels, alphas(SMEM), emb_table, ln_g, ln_b,
    [W,b,gamma,beta] * L, W_out, b_out, recon(out)."""
    L = num_hidden_layers
    x_ref, lbl_ref, alphas_ref, emb_ref, ln_g_ref, ln_b_ref = refs[:6]
    layer_refs = [refs[6 + 4 * l: 6 + 4 * (l + 1)] for l in range(L)]
    w_out_ref, b_out_ref, recon_ref = refs[6 + 4 * L: 6 + 4 * L + 3]

    f32 = jnp.float32
    tile_n = x_ref.shape[0]
    Hp = ln_g_ref.shape[-1]
    Bp = emb_ref.shape[0]
    Op = recon_ref.shape[-1]

    # Hoisted lane masks (constant per grid step; avoid per-layer re-broadcast).
    if Hp == hidden_real:
        h_mask = None
        e_mask = None
    else:
        h_mask = jax.lax.broadcasted_iota(jnp.int32, (tile_n, Hp), 1) < hidden_real
        e_mask = jax.lax.broadcasted_iota(jnp.int32, (Bp, Hp), 1) < hidden_real

    # Shared residual term: LayerNorm(batch_emb)[batch_labels].
    # LN on the tiny resident table, then a one-hot MXU matmul selects each
    # row's embedding (exact in f32; avoids a (N, H) HBM gather round-trip).
    emb_ln = _masked_layernorm(emb_ref[...].astype(f32), ln_g_ref[...],
                               ln_b_ref[...], hidden_real, e_mask)
    lbl = lbl_ref[...]                                            # (tile_n, 1) i32
    onehot = (lbl == jax.lax.broadcasted_iota(jnp.int32, (tile_n, Bp), 1))
    emb_add = jnp.dot(onehot.astype(mm_dtype), emb_ln.astype(mm_dtype),
                      preferred_element_type=f32)                 # (tile_n, Hp)

    h_mm = x_ref[...].astype(mm_dtype)
    acc = jnp.zeros((tile_n, Op), f32)
    for l in range(L):
        w_ref, b_ref, g_ref, bt_ref = layer_refs[l]
        z = jnp.dot(h_mm, w_ref[...], preferred_element_type=f32) + b_ref[...]
        z = _prelu(z, alphas_ref[l])                              # SMEM scalar
        # Dropout -> identity in eval mode.
        # TODO(synk): create_norm(norm, hidden_dim) assumed to be LayerNorm.
        z = _masked_layernorm(z, g_ref[...], bt_ref[...], hidden_real, h_mask)
        h = z + emb_add
        h_mm = h.astype(mm_dtype)
        # Fused "concat(hist, 1) @ W_out": per-layer partial matmul into acc.
        acc = acc + jnp.dot(h_mm, w_out_ref[pl.ds(l * Hp, Hp), :],
                            preferred_element_type=f32)

    out = _prelu(acc + b_out_ref[...], alphas_ref[L])
    recon_ref[...] = out.astype(recon_ref.dtype)


def resmlp_decoder_forward(x_dict, params, *, tile_n=None,
                           matmul_dtype=jnp.float32):
    x = x_dict['h']                       # (N, in_dim)
    batch = x_dict['batch']               # (N,) int32
    N, in_dim = x.shape
    L = len(params['layers'])
    H = params['layers'][0]['W'].shape[-1]
    out_dim = params['W_out'].shape[-1]
    batch_num = params['batch_emb'].shape[0]

    # Lane-dense padding of all feature dims (unmasked stores, full vregs).
    Din = _round_up(in_dim, 128)
    Hp = _round_up(H, 128)
    Op = _round_up(out_dim, 128)
    Bp = _round_up(batch_num, 128)

    if tile_n is None:
        tile_n = min(256, _round_up(N, 8))   # large row tiles for the MXU
    Np = _round_up(N, tile_n)
    grid = (Np // tile_n,)

    mmdt = matmul_dtype
    f32 = jnp.float32

    # ---- pad / cast parameters (wrapper glue; semantics unchanged) ----------
    x_p = jnp.zeros((Np, Din), x.dtype).at[:N, :in_dim].set(x)
    lbl_p = jnp.zeros((Np, 1), jnp.int32).at[:N, 0].set(batch.astype(jnp.int32))
    emb_p = jnp.zeros((Bp, Hp), f32).at[:batch_num, :H].set(params['batch_emb'])
    ln_g_p = jnp.zeros((1, Hp), f32).at[:, :H].set(params['ln_gamma'])
    ln_b_p = jnp.zeros((1, Hp), f32).at[:, :H].set(params['ln_beta'])

    layer_inputs = []
    prev, prev_p = in_dim, Din
    for lp in params['layers']:
        W_p = jnp.zeros((prev_p, Hp), mmdt).at[:prev, :H].set(lp['W'].astype(mmdt))
        b_p = jnp.zeros((1, Hp), f32).at[:, :H].set(lp['b'])
        g_p = jnp.zeros((1, Hp), f32).at[:, :H].set(lp['gamma'])
        bt_p = jnp.zeros((1, Hp), f32).at[:, :H].set(lp['beta'])
        layer_inputs += [W_p, b_p, g_p, bt_p]
        prev, prev_p = H, Hp

    w_out_p = jnp.zeros((L, Hp, Op), mmdt).at[:, :H, :out_dim].set(
        params['W_out'].reshape(L, H, out_dim).astype(mmdt)).reshape(L * Hp, Op)
    b_out_p = jnp.zeros((1, Op), f32).at[:, :out_dim].set(params['b_out'])
    alphas = params['alphas'].astype(f32)            # (L+1,) -> SMEM

    inputs = [x_p, lbl_p, alphas, emb_p, ln_g_p, ln_b_p,
              *layer_inputs, w_out_p, b_out_p]

    def _full(a):
        return pl.BlockSpec(a.shape, lambda i, _n=a.ndim: (0,) * _n)

    # TODO(synk): on v7x, mark the constant-index weight specs with
    # pipeline_mode=pl.Buffered(1) to halve resident-weight VMEM.
    in_specs = [
        pl.BlockSpec((tile_n, Din), lambda i: (i, 0)),
        pl.BlockSpec((tile_n, 1), lambda i: (i, 0)),
        pl.BlockSpec(memory_space=pltpu.MemorySpace.SMEM),   # alphas: scalar reads
        _full(emb_p), _full(ln_g_p), _full(ln_b_p),
        *[_full(a) for a in layer_inputs],
        _full(w_out_p), _full(b_out_p),
    ]

    # VMEM budget: double-buffered inputs/outputs + live f32 intermediates.
    const_bytes = sum(int(np.prod(a.shape)) * a.dtype.itemsize
                      for a in [emb_p, ln_g_p, ln_b_p, *layer_inputs,
                                w_out_p, b_out_p])
    tile_bytes = tile_n * (Din * x_p.dtype.itemsize + 4 + Op * 4)
    live_bytes = 8 * tile_n * max(Hp, Op, Bp) * 4
    est = 2 * (const_bytes + tile_bytes) + live_bytes + (2 << 20)
    vmem_limit = int(min(max(est, 32 << 20), 48 << 20))

    recon_pad = pl.pallas_call(
        functools.partial(_resmlp_kernel, L, H, mmdt),
        out_shape=jax.ShapeDtypeStruct((Np, Op), x.dtype),
        grid_spec=pltpu.PrefetchScalarGridSpec(
            num_scalar_prefetch=0,
            grid=grid,
            in_specs=in_specs,
            out_specs=pl.BlockSpec((tile_n, Op), lambda i: (i, 0)),
        ),
        compiler_params=pltpu.CompilerParams(
            dimension_semantics=("parallel",),
            vmem_limit_bytes=vmem_limit),
    )(*inputs)

    recon = recon_pad[:N, :out_dim]
    return {'recon': recon, 'latent': x_dict['h']}


# ----------------------------- test harness ---------------------------------

def init_params(key, in_dim, hidden_dim, out_dim, num_layers, batch_num):
    assert num_layers > 1
    L = num_layers - 1
    keys = jax.random.split(key, 2 * L + 3)
    layers = []
    for i in range(L):
        dim = in_dim if i == 0 else hidden_dim
        W = (jax.random.normal(keys[2 * i], (dim, hidden_dim), jnp.float32)
             / np.sqrt(dim))
        b = 0.01 * jax.random.normal(keys[2 * i + 1], (1, hidden_dim), jnp.float32)
        layers.append({
            'W': W, 'b': b,
            'gamma': jnp.ones((1, hidden_dim), jnp.float32),   # create_norm LN
            'beta': jnp.zeros((1, hidden_dim), jnp.float32),
        })
    W_out = (jax.random.normal(keys[2 * L], (hidden_dim * L, out_dim), jnp.float32)
             / np.sqrt(hidden_dim * L))
    b_out = 0.01 * jax.random.normal(keys[2 * L + 1], (1, out_dim), jnp.float32)
    batch_emb = jax.random.normal(keys[2 * L + 2], (batch_num, hidden_dim),
                                  jnp.float32)
    return {
        'layers': layers,
        'W_out': W_out,
        'b_out': b_out,
        'batch_emb': batch_emb,
        'ln_gamma': jnp.ones((1, hidden_dim), jnp.float32),     # shared LayerNorm
        'ln_beta': jnp.zeros((1, hidden_dim), jnp.float32),
        'alphas': jnp.full((L + 1,), 0.25, jnp.float32),        # PReLU (torch default)
    }


def _ln_ref(x, g, b):
    mu = jnp.mean(x, axis=-1, keepdims=True)
    var = jnp.mean((x - mu) ** 2, axis=-1, keepdims=True)
    return (x - mu) * jax.lax.rsqrt(var + EPS) * g + b


def reference_forward(x_dict, params):
    x = x_dict['h']
    emb = params['batch_emb'][x_dict['batch']]
    emb_add = _ln_ref(emb, params['ln_gamma'], params['ln_beta'])
    h = x
    hist = []
    for l, lp in enumerate(params['layers']):
        h = h @ lp['W'] + lp['b']
        h = _prelu(h, params['alphas'][l])
        h = _ln_ref(h, lp['gamma'], lp['beta'])
        h = h + emb_add
        hist.append(h)
    cat = jnp.concatenate(hist, axis=-1)
    out = _prelu(cat @ params['W_out'] + params['b_out'],
                 params['alphas'][len(params['layers'])])
    return {'recon': out, 'latent': x_dict['h']}


if __name__ == "__main__":
    N, in_dim, hidden_dim, out_dim = 8, 32, 32, 16
    num_layers, batch_num = 3, 4

    key = jax.random.PRNGKey(0)
    kx, kb, kp = jax.random.split(key, 3)
    x_dict = {
        'h': jax.random.normal(kx, (N, in_dim), jnp.float32),
        'batch': jax.random.randint(kb, (N,), 0, batch_num, jnp.int32),
    }
    params = init_params(kp, in_dim, hidden_dim, out_dim, num_layers, batch_num)

    ref = reference_forward(x_dict, params)

    # f32 matmul path (tight check vs. reference)
    out32 = resmlp_decoder_forward(x_dict, params, matmul_dtype=jnp.float32)
    jax.block_until_ready(out32['recon'])
    np.testing.assert_allclose(np.asarray(out32['recon']),
                               np.asarray(ref['recon']), rtol=1e-4, atol=1e-4)
    np.testing.assert_allclose(np.asarray(out32['latent']),
                               np.asarray(x_dict['h']))

    # bf16 MXU path (production config, looser tolerance)
    out16 = resmlp_decoder_forward(x_dict, params, matmul_dtype=jnp.bfloat16)
    jax.block_until_ready(out16['recon'])
    np.testing.assert_allclose(np.asarray(out16['recon']),
                               np.asarray(ref['recon']), rtol=5e-2, atol=5e-2)

    print("KERNEL_OK")
</pallas_src>

<mosaic_0001>
module attributes {stable_mosaic.version = 11 : i64} {
  func.func @_resmlp_kernel(%arg0: i32, %arg1: memref<8x128xf32, #tpu.memory_space<vmem>>, %arg2: memref<8x1xi32, #tpu.memory_space<vmem>>, %arg3: memref<3xf32, #tpu.memory_space<smem>>, %arg4: memref<128x128xf32, #tpu.memory_space<vmem>>, %arg5: memref<1x128xf32, #tpu.memory_space<vmem>>, %arg6: memref<1x128xf32, #tpu.memory_space<vmem>>, %arg7: memref<128x128xf32, #tpu.memory_space<vmem>>, %arg8: memref<1x128xf32, #tpu.memory_space<vmem>>, %arg9: memref<1x128xf32, #tpu.memory_space<vmem>>, %arg10: memref<1x128xf32, #tpu.memory_space<vmem>>, %arg11: memref<128x128xf32, #tpu.memory_space<vmem>>, %arg12: memref<1x128xf32, #tpu.memory_space<vmem>>, %arg13: memref<1x128xf32, #tpu.memory_space<vmem>>, %arg14: memref<1x128xf32, #tpu.memory_space<vmem>>, %arg15: memref<256x128xf32, #tpu.memory_space<vmem>>, %arg16: memref<1x128xf32, #tpu.memory_space<vmem>>, %arg17: memref<8x128xf32, #tpu.memory_space<vmem>>) attributes {dimension_semantics = [#tpu.dimension_semantics<parallel>], iteration_bounds = array<i64: 1>, scalar_prefetch = 0 : i64, scratch_operands = 0 : i64, tpu.core_type = #tpu.core_type<tc>, window_params = [{transform_indices = @transform_0, window_bounds = array<i64: 8, 128>}, {transform_indices = @transform_1, window_bounds = array<i64: 8, 1>}, {transform_indices = @transform_2, window_bounds = array<i64: 3>}, {pipeline_mode = #tpu.pipeline_mode<synchronous>, transform_indices = @transform_3, window_bounds = array<i64: 128, 128>}, {pipeline_mode = #tpu.pipeline_mode<synchronous>, transform_indices = @transform_4, window_bounds = array<i64: 1, 128>}, {pipeline_mode = #tpu.pipeline_mode<synchronous>, transform_indices = @transform_5, window_bounds = array<i64: 1, 128>}, {pipeline_mode = #tpu.pipeline_mode<synchronous>, transform_indices = @transform_6, window_bounds = array<i64: 128, 128>}, {pipeline_mode = #tpu.pipeline_mode<synchronous>, transform_indices = @transform_7, window_bounds = array<i64: 1, 128>}, {pipeline_mode = #tpu.pipeline_mode<synchronous>, transform_indices = @transform_8, window_bounds = array<i64: 1, 128>}, {pipeline_mode = #tpu.pipeline_mode<synchronous>, transform_indices = @transform_9, window_bounds = array<i64: 1, 128>}, {pipeline_mode = #tpu.pipeline_mode<synchronous>, transform_indices = @transform_10, window_bounds = array<i64: 128, 128>}, {pipeline_mode = #tpu.pipeline_mode<synchronous>, transform_indices = @transform_11, window_bounds = array<i64: 1, 128>}, {pipeline_mode = #tpu.pipeline_mode<synchronous>, transform_indices = @transform_12, window_bounds = array<i64: 1, 128>}, {pipeline_mode = #tpu.pipeline_mode<synchronous>, transform_indices = @transform_13, window_bounds = array<i64: 1, 128>}, {pipeline_mode = #tpu.pipeline_mode<synchronous>, transform_indices = @transform_14, window_bounds = array<i64: 256, 128>}, {pipeline_mode = #tpu.pipeline_mode<synchronous>, transform_indices = @transform_15, window_bounds = array<i64: 1, 128>}, {transform_indices = @transform_16, window_bounds = array<i64: 8, 128>}]} {
    %0 = tpu.iota {dimensions = array<i32: 1>} : vector<8x128xi32>
    %c32_i32 = arith.constant 32 : i32
    %1 = vector.broadcast %c32_i32 : i32 to vector<8x128xi32>
    %2 = arith.cmpi slt, %0, %1 : vector<8x128xi32>
    %3 = tpu.iota {dimensions = array<i32: 1>} : vector<128x128xi32>
    %c32_i32_0 = arith.constant 32 : i32
    %4 = vector.broadcast %c32_i32_0 : i32 to vector<128x128xi32>
    %5 = arith.cmpi slt, %3, %4 : vector<128x128xi32>
    %c0 = arith.constant 0 : index
    %c0_1 = arith.constant 0 : index
    %6 = vector.load %arg4[%c0, %c0_1] : memref<128x128xf32, #tpu.memory_space<vmem>>, vector<128x128xf32>
    %c0_2 = arith.constant 0 : index
    %c0_3 = arith.constant 0 : index
    %7 = vector.load %arg5[%c0_2, %c0_3] : memref<1x128xf32, #tpu.memory_space<vmem>>, vector<1x128xf32>
    %c0_4 = arith.constant 0 : index
    %c0_5 = arith.constant 0 : index
    %8 = vector.load %arg6[%c0_4, %c0_5] : memref<1x128xf32, #tpu.memory_space<vmem>>, vector<1x128xf32>
    %cst = arith.constant dense<0.000000e+00> : vector<128xf32>
    %9 = vector.multi_reduction <add>, %6, %cst [1] : vector<128x128xf32> to vector<128xf32>
    %10 = vector.shape_cast %9 : vector<128xf32> to vector<128x1xf32>
    %cst_6 = arith.constant 3.125000e-02 : f32
    %11 = vector.broadcast %cst_6 : f32 to vector<128x1xf32>
    %12 = arith.mulf %10, %11 : vector<128x1xf32>
    %13 = vector.broadcast %12 : vector<128x1xf32> to vector<128x128xf32>
    %14 = arith.subf %6, %13 : vector<128x128xf32>
    %cst_7 = arith.constant 0.000000e+00 : f32
    %15 = vector.broadcast %cst_7 : f32 to vector<128x128xf32>
    %16 = arith.select %5, %14, %15 : vector<128x128xi1>, vector<128x128xf32>
    %17 = arith.mulf %16, %16 : vector<128x128xf32>
    %cst_8 = arith.constant dense<0.000000e+00> : vector<128xf32>
    %18 = vector.multi_reduction <add>, %17, %cst_8 [1] : vector<128x128xf32> to vector<128xf32>
    %19 = vector.shape_cast %18 : vector<128xf32> to vector<128x1xf32>
    %cst_9 = arith.constant 3.125000e-02 : f32
    %20 = vector.broadcast %cst_9 : f32 to vector<128x1xf32>
    %21 = arith.mulf %19, %20 : vector<128x1xf32>
    %cst_10 = arith.constant 9.99999974E-6 : f32
    %22 = vector.broadcast %cst_10 : f32 to vector<128x1xf32>
    %23 = arith.addf %21, %22 : vector<128x1xf32>
    %24 = math.rsqrt %23 : vector<128x1xf32>
    %25 = vector.broadcast %24 : vector<128x1xf32> to vector<128x128xf32>
    %26 = arith.mulf %16, %25 : vector<128x128xf32>
    %27 = vector.broadcast %7 : vector<1x128xf32> to vector<128x128xf32>
    %28 = arith.mulf %26, %27 : vector<128x128xf32>
    %29 = vector.broadcast %8 : vector<1x128xf32> to vector<128x128xf32>
    %30 = arith.addf %28, %29 : vector<128x128xf32>
    %c0_11 = arith.constant 0 : index
    %c0_12 = arith.constant 0 : index
    %31 = vector.load %arg2[%c0_11, %c0_12] : memref<8x1xi32, #tpu.memory_space<vmem>>, vector<8x1xi32>
    %32 = tpu.iota {dimensions = array<i32: 1>} : vector<8x128xi32>
    %33 = vector.broadcast %31 : vector<8x1xi32> to vector<8x128xi32>
    %34 = arith.cmpi eq, %33, %32 : vector<8x128xi32>
    %35 = arith.extui %34 : vector<8x128xi1> to vector<8x128xi32>
    %36 = arith.sitofp %35 : vector<8x128xi32> to vector<8x128xf32>
    %cst_13 = arith.constant dense<0.000000e+00> : vector<8x128xf32>
    %37 = tpu.matmul %36, %30, %cst_13 {dimension_numbers = #tpu.dot_dimension_numbers<[1], [0], [0], [1], [0, 0, 1, 1], [], []>} : vector<8x128xf32>, vector<128x128xf32>, vector<8x128xf32> -> vector<8x128xf32>
    %c0_14 = arith.constant 0 : index
    %c0_15 = arith.constant 0 : index
    %38 = vector.load %arg1[%c0_14, %c0_15] : memref<8x128xf32, #tpu.memory_space<vmem>>, vector<8x128xf32>
    %cst_16 = arith.constant 0.000000e+00 : f32
    %39 = vector.broadcast %cst_16 : f32 to vector<8x128xf32>
    %c0_17 = arith.constant 0 : index
    %c0_18 = arith.constant 0 : index
    %40 = vector.load %arg7[%c0_17, %c0_18] : memref<128x128xf32, #tpu.memory_space<vmem>>, vector<128x128xf32>
    %cst_19 = arith.constant dense<0.000000e+00> : vector<8x128xf32>
    %41 = tpu.matmul %38, %40, %cst_19 {dimension_numbers = #tpu.dot_dimension_numbers<[1], [0], [0], [1], [0, 0, 1, 1], [], []>} : vector<8x128xf32>, vector<128x128xf32>, vector<8x128xf32> -> vector<8x128xf32>
    %c0_20 = arith.constant 0 : index
    %c0_21 = arith.constant 0 : index
    %42 = vector.load %arg8[%c0_20, %c0_21] : memref<1x128xf32, #tpu.memory_space<vmem>>, vector<1x128xf32>
    %43 = vector.broadcast %42 : vector<1x128xf32> to vector<8x128xf32>
    %44 = arith.addf %41, %43 : vector<8x128xf32>
    %c0_22 = arith.constant 0 : index
    %45 = memref.load %arg3[%c0_22] : memref<3xf32, #tpu.memory_space<smem>>
    %cst_23 = arith.constant 0.000000e+00 : f32
    %46 = vector.broadcast %cst_23 : f32 to vector<8x128xf32>
    %47 = arith.cmpf ogt, %44, %46 : vector<8x128xf32>
    %48 = vector.broadcast %45 : f32 to vector<8x128xf32>
    %49 = arith.mulf %48, %44 : vector<8x128xf32>
    %50 = arith.select %47, %44, %49 : vector<8x128xi1>, vector<8x128xf32>
    %c0_24 = arith.constant 0 : index
    %c0_25 = arith.constant 0 : index
    %51 = vector.load %arg9[%c0_24, %c0_25] : memref<1x128xf32, #tpu.memory_space<vmem>>, vector<1x128xf32>
    %c0_26 = arith.constant 0 : index
    %c0_27 = arith.constant 0 : index
    %52 = vector.load %arg10[%c0_26, %c0_27] : memref<1x128xf32, #tpu.memory_space<vmem>>, vector<1x128xf32>
    %cst_28 = arith.constant dense<0.000000e+00> : vector<8xf32>
    %53 = vector.multi_reduction <add>, %50, %cst_28 [1] : vector<8x128xf32> to vector<8xf32>
    %54 = vector.shape_cast %53 : vector<8xf32> to vector<8x1xf32>
    %cst_29 = arith.constant 3.125000e-02 : f32
    %55 = vector.broadcast %cst_29 : f32 to vector<8x1xf32>
    %56 = arith.mulf %54, %55 : vector<8x1xf32>
    %57 = vector.broadcast %56 : vector<8x1xf32> to vector<8x128xf32>
    %58 = arith.subf %50, %57 : vector<8x128xf32>
    %cst_30 = arith.constant 0.000000e+00 : f32
    %59 = vector.broadcast %cst_30 : f32 to vector<8x128xf32>
    %60 = arith.select %2, %58, %59 : vector<8x128xi1>, vector<8x128xf32>
    %61 = arith.mulf %60, %60 : vector<8x128xf32>
    %cst_31 = arith.constant dense<0.000000e+00> : vector<8xf32>
    %62 = vector.multi_reduction <add>, %61, %cst_31 [1] : vector<8x128xf32> to vector<8xf32>
    %63 = vector.shape_cast %62 : vector<8xf32> to vector<8x1xf32>
    %cst_32 = arith.constant 3.125000e-02 : f32
    %64 = vector.broadcast %cst_32 : f32 to vector<8x1xf32>
    %65 = arith.mulf %63, %64 : vector<8x1xf32>
    %cst_33 = arith.constant 9.99999974E-6 : f32
    %66 = vector.broadcast %cst_33 : f32 to vector<8x1xf32>
    %67 = arith.addf %65, %66 : vector<8x1xf32>
    %68 = math.rsqrt %67 : vector<8x1xf32>
    %69 = vector.broadcast %68 : vector<8x1xf32> to vector<8x128xf32>
    %70 = arith.mulf %60, %69 : vector<8x128xf32>
    %71 = vector.broadcast %51 : vector<1x128xf32> to vector<8x128xf32>
    %72 = arith.mulf %70, %71 : vector<8x128xf32>
    %73 = vector.broadcast %52 : vector<1x128xf32> to vector<8x128xf32>
    %74 = arith.addf %72, %73 : vector<8x128xf32>
    %75 = arith.addf %74, %37 : vector<8x128xf32>
    %c0_34 = arith.constant 0 : index
    %c0_35 = arith.constant 0 : index
    %76 = vector.load %arg15[%c0_34, %c0_35] : memref<256x128xf32, #tpu.memory_space<vmem>>, vector<128x128xf32>
    %cst_36 = arith.constant dense<0.000000e+00> : vector<8x128xf32>
    %77 = tpu.matmul %75, %76, %cst_36 {dimension_numbers = #tpu.dot_dimension_numbers<[1], [0], [0], [1], [0, 0, 1, 1], [], []>} : vector<8x128xf32>, vector<128x128xf32>, vector<8x128xf32> -> vector<8x128xf32>
    %78 = arith.addf %39, %77 : vector<8x128xf32>
    %c0_37 = arith.constant 0 : index
    %c0_38 = arith.constant 0 : index
    %79 = vector.load %arg11[%c0_37, %c0_38] : memref<128x128xf32, #tpu.memory_space<vmem>>, vector<128x128xf32>
    %cst_39 = arith.constant dense<0.000000e+00> : vector<8x128xf32>
    %80 = tpu.matmul %75, %79, %cst_39 {dimension_numbers = #tpu.dot_dimension_numbers<[1], [0], [0], [1], [0, 0, 1, 1], [], []>} : vector<8x128xf32>, vector<128x128xf32>, vector<8x128xf32> -> vector<8x128xf32>
    %c0_40 = arith.constant 0 : index
    %c0_41 = arith.constant 0 : index
    %81 = vector.load %arg12[%c0_40, %c0_41] : memref<1x128xf32, #tpu.memory_space<vmem>>, vector<1x128xf32>
    %82 = vector.broadcast %81 : vector<1x128xf32> to vector<8x128xf32>
    %83 = arith.addf %80, %82 : vector<8x128xf32>
    %c1 = arith.constant 1 : index
    %84 = memref.load %arg3[%c1] : memref<3xf32, #tpu.memory_space<smem>>
    %cst_42 = arith.constant 0.000000e+00 : f32
    %85 = vector.broadcast %cst_42 : f32 to vector<8x128xf32>
    %86 = arith.cmpf ogt, %83, %85 : vector<8x128xf32>
    %87 = vector.broadcast %84 : f32 to vector<8x128xf32>
    %88 = arith.mulf %87, %83 : vector<8x128xf32>
    %89 = arith.select %86, %83, %88 : vector<8x128xi1>, vector<8x128xf32>
    %c0_43 = arith.constant 0 : index
    %c0_44 = arith.constant 0 : index
    %90 = vector.load %arg13[%c0_43, %c0_44] : memref<1x128xf32, #tpu.memory_space<vmem>>, vector<1x128xf32>
    %c0_45 = arith.constant 0 : index
    %c0_46 = arith.constant 0 : index
    %91 = vector.load %arg14[%c0_45, %c0_46] : memref<1x128xf32, #tpu.memory_space<vmem>>, vector<1x128xf32>
    %cst_47 = arith.constant dense<0.000000e+00> : vector<8xf32>
    %92 = vector.multi_reduction <add>, %89, %cst_47 [1] : vector<8x128xf32> to vector<8xf32>
    %93 = vector.shape_cast %92 : vector<8xf32> to vector<8x1xf32>
    %cst_48 = arith.constant 3.125000e-02 : f32
    %94 = vector.broadcast %cst_48 : f32 to vector<8x1xf32>
    %95 = arith.mulf %93, %94 : vector<8x1xf32>
    %96 = vector.broadcast %95 : vector<8x1xf32> to vector<8x128xf32>
    %97 = arith.subf %89, %96 : vector<8x128xf32>
    %cst_49 = arith.constant 0.000000e+00 : f32
    %98 = vector.broadcast %cst_49 : f32 to vector<8x128xf32>
    %99 = arith.select %2, %97, %98 : vector<8x128xi1>, vector<8x128xf32>
    %100 = arith.mulf %99, %99 : vector<8x128xf32>
    %cst_50 = arith.constant dense<0.000000e+00> : vector<8xf32>
    %101 = vector.multi_reduction <add>, %100, %cst_50 [1] : vector<8x128xf32> to vector<8xf32>
    %102 = vector.shape_cast %101 : vector<8xf32> to vector<8x1xf32>
    %cst_51 = arith.constant 3.125000e-02 : f32
    %103 = vector.broadcast %cst_51 : f32 to vector<8x1xf32>
    %104 = arith.mulf %102, %103 : vector<8x1xf32>
    %cst_52 = arith.constant 9.99999974E-6 : f32
    %105 = vector.broadcast %cst_52 : f32 to vector<8x1xf32>
    %106 = arith.addf %104, %105 : vector<8x1xf32>
    %107 = math.rsqrt %106 : vector<8x1xf32>
    %108 = vector.broadcast %107 : vector<8x1xf32> to vector<8x128xf32>
    %109 = arith.mulf %99, %108 : vector<8x128xf32>
    %110 = vector.broadcast %90 : vector<1x128xf32> to vector<8x128xf32>
    %111 = arith.mulf %109, %110 : vector<8x128xf32>
    %112 = vector.broadcast %91 : vector<1x128xf32> to vector<8x128xf32>
    %113 = arith.addf %111, %112 : vector<8x128xf32>
    %114 = arith.addf %113, %37 : vector<8x128xf32>
    %c128 = arith.constant 128 : index
    %c0_53 = arith.constant 0 : index
    %115 = vector.load %arg15[%c128, %c0_53] : memref<256x128xf32, #tpu.memory_space<vmem>>, vector<128x128xf32>
    %cst_54 = arith.constant dense<0.000000e+00> : vector<8x128xf32>
    %116 = tpu.matmul %114, %115, %cst_54 {dimension_numbers = #tpu.dot_dimension_numbers<[1], [0], [0], [1], [0, 0, 1, 1], [], []>} : vector<8x128xf32>, vector<128x128xf32>, vector<8x128xf32> -> vector<8x128xf32>
    %117 = arith.addf %78, %116 : vector<8x128xf32>
    %c0_55 = arith.constant 0 : index
    %c0_56 = arith.constant 0 : index
    %118 = vector.load %arg16[%c0_55, %c0_56] : memref<1x128xf32, #tpu.memory_space<vmem>>, vector<1x128xf32>
    %119 = vector.broadcast %118 : vector<1x128xf32> to vector<8x128xf32>
    %120 = arith.addf %117, %119 : vector<8x128xf32>
    %c2 = arith.constant 2 : index
    %121 = memref.load %arg3[%c2] : memref<3xf32, #tpu.memory_space<smem>>
    %cst_57 = arith.constant 0.000000e+00 : f32
    %122 = vector.broadcast %cst_57 : f32 to vector<8x128xf32>
    %123 = arith.cmpf ogt, %120, %122 : vector<8x128xf32>
    %124 = vector.broadcast %121 : f32 to vector<8x128xf32>
    %125 = arith.mulf %124, %120 : vector<8x128xf32>
    %126 = arith.select %123, %120, %125 : vector<8x128xi1>, vector<8x128xf32>
    %c0_58 = arith.constant 0 : index
    %c0_59 = arith.constant 0 : index
    %127 = vector.load %arg17[%c0_58, %c0_59] : memref<8x128xf32, #tpu.memory_space<vmem>>, vector<8x128xf32>
    tpu.vector_store %arg17[%c0_58, %c0_59], %126 {strides = array<i32>} : memref<8x128xf32, #tpu.memory_space<vmem>>, vector<8x128xf32>,
    return
  }
  func.func @transform_0(%arg0: i32) -> (i32, i32) {
    %c0_i32 = arith.constant 0 : i32
    %c0_i32_0 = arith.constant 0 : i32
    return %arg0, %c0_i32 : i32, i32
  }
  func.func @transform_1(%arg0: i32) -> (i32, i32) {
    %c0_i32 = arith.constant 0 : i32
    %c0_i32_0 = arith.constant 0 : i32
    return %arg0, %c0_i32 : i32, i32
  }
  func.func @transform_2(%arg0: i32) -> i32 {
    %c0_i32 = arith.constant 0 : i32
    %c0_i32_0 = arith.constant 0 : i32
    return %c0_i32 : i32
  }
  func.func @transform_3(%arg0: i32) -> (i32, i32) {
    %c0_i32 = arith.constant 0 : i32
    %c0_i32_0 = arith.constant 0 : i32
    %c0_i32_1 = arith.constant 0 : i32
    return %c0_i32, %c0_i32_0 : i32, i32
  }
  func.func @transform_4(%arg0: i32) -> (i32, i32) {
    %c0_i32 = arith.constant 0 : i32
    %c0_i32_0 = arith.constant 0 : i32
    %c0_i32_1 = arith.constant 0 : i32
    return %c0_i32, %c0_i32_0 : i32, i32
  }
  func.func @transform_5(%arg0: i32) -> (i32, i32) {
    %c0_i32 = arith.constant 0 : i32
    %c0_i32_0 = arith.constant 0 : i32
    %c0_i32_1 = arith.constant 0 : i32
    return %c0_i32, %c0_i32_0 : i32, i32
  }
  func.func @transform_6(%arg0: i32) -> (i32, i32) {
    %c0_i32 = arith.constant 0 : i32
    %c0_i32_0 = arith.constant 0 : i32
    %c0_i32_1 = arith.constant 0 : i32
    return %c0_i32, %c0_i32_0 : i32, i32
  }
  func.func @transform_7(%arg0: i32) -> (i32, i32) {
    %c0_i32 = arith.constant 0 : i32
    %c0_i32_0 = arith.constant 0 : i32
    %c0_i32_1 = arith.constant 0 : i32
    return %c0_i32, %c0_i32_0 : i32, i32
  }
  func.func @transform_8(%arg0: i32) -> (i32, i32) {
    %c0_i32 = arith.constant 0 : i32
    %c0_i32_0 = arith.constant 0 : i32
    %c0_i32_1 = arith.constant 0 : i32
    return %c0_i32, %c0_i32_0 : i32, i32
  }
  func.func @transform_9(%arg0: i32) -> (i32, i32) {
    %c0_i32 = arith.constant 0 : i32
    %c0_i32_0 = arith.constant 0 : i32
    %c0_i32_1 = arith.constant 0 : i32
    return %c0_i32, %c0_i32_0 : i32, i32
  }
  func.func @transform_10(%arg0: i32) -> (i32, i32) {
    %c0_i32 = arith.constant 0 : i32
    %c0_i32_0 = arith.constant 0 : i32
    %c0_i32_1 = arith.constant 0 : i32
    return %c0_i32, %c0_i32_0 : i32, i32
  }
  func.func @transform_11(%arg0: i32) -> (i32, i32) {
    %c0_i32 = arith.constant 0 : i32
    %c0_i32_0 = arith.constant 0 : i32
    %c0_i32_1 = arith.constant 0 : i32
    return %c0_i32, %c0_i32_0 : i32, i32
  }
  func.func @transform_12(%arg0: i32) -> (i32, i32) {
    %c0_i32 = arith.constant 0 : i32
    %c0_i32_0 = arith.constant 0 : i32
    %c0_i32_1 = arith.constant 0 : i32
    return %c0_i32, %c0_i32_0 : i32, i32
  }
  func.func @transform_13(%arg0: i32) -> (i32, i32) {
    %c0_i32 = arith.constant 0 : i32
    %c0_i32_0 = arith.constant 0 : i32
    %c0_i32_1 = arith.constant 0 : i32
    return %c0_i32, %c0_i32_0 : i32, i32
  }
  func.func @transform_14(%arg0: i32) -> (i32, i32) {
    %c0_i32 = arith.constant 0 : i32
    %c0_i32_0 = arith.constant 0 : i32
    %c0_i32_1 = arith.constant 0 : i32
    return %c0_i32, %c0_i32_0 : i32, i32
  }
  func.func @transform_15(%arg0: i32) -> (i32, i32) {
    %c0_i32 = arith.constant 0 : i32
    %c0_i32_0 = arith.constant 0 : i32
    %c0_i32_1 = arith.constant 0 : i32
    return %c0_i32, %c0_i32_0 : i32, i32
  }
  func.func @transform_16(%arg0: i32) -> (i32, i32) {
    %c0_i32 = arith.constant 0 : i32
    %c0_i32_0 = arith.constant 0 : i32
    return %arg0, %c0_i32 : i32, i32
  }
}

</mosaic_0001>

<bundles_post_ra>
// kernel: tpu_custom_call.1
= control target key start
LH: loop header
LB: loop body
LE: loop exit
PB: predicated region body
PF: predicated region fallthrough
CT: control target
= control target key end

     0   :  { %s1981_s0 = inlined_call_operand.vmem [shape: f32[8,128], index: 0, kind: input, shape index: {}]   ;;  %s1982_s1 = inlined_call_operand.vmem [shape: s32[8,1], index: 1, kind: input, shape index: {}]   ;;  %s1983_s2 = inlined_call_operand.vmem [shape: f32[3], index: 2, kind: input, shape index: {}]   ;;  %s1984_s3 = inlined_call_operand.hbm [shape: f32[128,128], index: 3, kind: input, shape index: {}]   ;;  %s1985_s4 = inlined_call_operand.vmem [shape: f32[1,128], index: 4, kind: input, shape index: {}]   ;;  %s1986_s5 = inlined_call_operand.vmem [shape: f32[1,128], index: 5, kind: input, shape index: {}]   ;;  %s1987_s6 = inlined_call_operand.hbm [shape: f32[128,128], index: 6, kind: input, shape index: {}]   ;;  %s1988_s7 = inlined_call_operand.vmem [shape: f32[1,128], index: 7, kind: input, shape index: {}]   ;;  %s1989_s8 = inlined_call_operand.vmem [shape: f32[1,128], index: 8, kind: input, shape index: {}]   ;;  %s1990_s9 = inlined_call_operand.vmem [shape: f32[1,128], index: 9, kind: input, shape index: {}]   ;;  %s1991_s10 = inlined_call_operand.hbm [shape: f32[128,128], index: 10, kind: input, shape index: {}]   ;;  %s1992_s11 = inlined_call_operand.vmem [shape: f32[1,128], index: 11, kind: input, shape index: {}]   ;;  %s1993_s12 = inlined_call_operand.vmem [shape: f32[1,128], index: 12, kind: input, shape index: {}]   ;;  %s1994_s13 = inlined_call_operand.vmem [shape: f32[1,128], index: 13, kind: input, shape index: {}]   ;;  %s1995_s14 = inlined_call_operand.hbm [shape: f32[256,128], index: 14, kind: input, shape index: {}]   ;;  %s1996_s15 = inlined_call_operand.vmem [shape: f32[1,128], index: 15, kind: input, shape index: {}]   ;;  %s1997_s16 = inlined_call_operand.hbm [shape: f32[8,128], index: 16, kind: output, shape index: {}]  }
   0x1   :  { %1998 = sst [smem:[#allocation18_spill]] %s1981_s0 }
   0x2   :  { %21 = vsyncpa [#allocation5], 0 }
   0x3   :  { %22 = vsyncpa [#allocation3], 0 }
   0x4   :  { %23 = vsyncpa [#allocation8], 0 }
   0x5   :  { %24 = vsyncpa [#allocation11], 0 }
   0x6   :  { %25 = vsyncpa [#allocation4], 0  ;;  %s36_s23 = sshll.u32 %s1983_s2, 4  ;;  %s1490_s24 = smov [#allocation7]   ;;  %s37_s23 = int_to_ptr.vmem [resolvable:$true] %s36_s23 }
   0x7   :  { %s61_s25 = sshll.u32 %s1490_s24, 4  ;;  %s1358_s28 = scalar_lea.hbm %s1987_s6, 2048  ;;  %s62_s25 = int_to_ptr.vmem [resolvable:$true] %s61_s25 }
   0x8   :  { %p1359_p0 = scmp.ne.s32.totalorder %s1987_s6, %s1358_s28  ;;  %p1362_p1 = scmp.lt.u32.totalorder %s1358_s28, %s1987_s6 }
   0xa   :  { %p1364_p2 = pnand %p1362_p1, %p1359_p0 }
   0xc   :  { %1367 = shalt.err (!%p1364_p2)
}
   0xd   :  { %s1368_s18 = scalar_lea.vmem %s62_s25, 2048  ;;  %p1373_p4 = scmp.lt.s32.totalorder %s62_s25, %s62_s25 }
   0xe   :  { %p1369_p3 = scmp.ne.s32.totalorder %s62_s25, %s1368_s18  ;;  %p1374_p5 = scmp.lt.s32.totalorder %s1368_s18, %s1368_s18 }
  0x10   :  { %p1375_p6 = por %p1374_p5, %p1373_p4 }
  0x12   :  { %p1376_p7 = pnand %p1375_p6, %p1369_p3 }
  0x14   :  { %1379 = shalt.err (!%p1376_p7)
}
  0x15   :  { %s1491_s2 = smov 128   ;;  %s1492_s19 = smov 8  }
  0x16   :  { %67 = dma.hbm_to_vmem [thread:$0]  %s1987_s6, 2048, %s62_s25, [#allocation8], %s1491_s2, %s1491_s2, %s1492_s19  }
  0x17   :  { %s1380_s22 = scalar_lea.vmem %s37_s23, 16  ;;  %p1385_p9 = scmp.lt.s32.totalorder %s37_s23, %s37_s23 }
  0x18   :  { %p1381_p8 = scmp.ne.s32.totalorder %s37_s23, %s1380_s22  ;;  %p1386_p10 = scmp.lt.s32.totalorder %s1380_s22, %s1380_s22 }
  0x1a   :  { %p1387_p11 = por %p1386_p10, %p1385_p9 }
  0x1c   :  { %p1388_p12 = pnand %p1387_p11, %p1381_p8 }
  0x1e   :  { %1391 = shalt.err (!%p1388_p12)
}
  0x1f   :  { %s1493_s24 = smov [#allocation2]   ;;  %s1494_s26 = smov [#allocation6]  }
  0x20   :  { %39 = dma.vmem_to_smem %s37_s23, 16, %s1493_s24, [#allocation5]  }
  0x21   :  { %s45_s27 = sshll.u32 %s1494_s26, 4  ;;  %s1495_s28 = smov [#allocation9]   ;;  %s46_s27 = int_to_ptr.vmem [resolvable:$true] %s45_s27 }
  0x22   :  { %s79_s29 = sshll.u32 %s1495_s28, 4  ;;  %s1392_s6 = scalar_lea.hbm %s1984_s3, 2048  ;;  %s1606_s29 = int_to_ptr.vmem [resolvable:$true] %s79_s29 }
  0x23   :  { %p1393_p13 = scmp.ne.s32.totalorder %s1984_s3, %s1392_s6  ;;  %p1396_p0 = scmp.lt.u32.totalorder %s1392_s6, %s1984_s3 }
  0x25   :  { %p1398_p1 = pnand %p1396_p0, %p1393_p13 }
  0x27   :  { %1401 = shalt.err (!%p1398_p1)
}
  0x28   :  { %s1402_s23 = scalar_lea.vmem %s46_s27, 2048  ;;  %p1407_p3 = scmp.lt.s32.totalorder %s46_s27, %s46_s27 }
  0x29   :  { %p1403_p2 = scmp.ne.s32.totalorder %s46_s27, %s1402_s23  ;;  %p1408_p4 = scmp.lt.s32.totalorder %s1402_s23, %s1402_s23 }
  0x2b   :  { %p1409_p5 = por %p1408_p4, %p1407_p3 }
  0x2d   :  { %p1410_p6 = pnand %p1409_p5, %p1403_p2 }
  0x2f   :  { %1413 = shalt.err (!%p1410_p6)
}
  0x30   :  { %51 = dma.hbm_to_vmem [thread:$0]  %s1984_s3, 2048, %s46_s27, [#allocation3], %s1491_s2, %s1491_s2, %s1492_s19  }
  0x31   :  { %s1414_s28 = scalar_lea.hbm %s1991_s10, 2048 }
  0x32   :  { %p1415_p7 = scmp.ne.s32.totalorder %s1991_s10, %s1414_s28  ;;  %p1418_p8 = scmp.lt.u32.totalorder %s1414_s28, %s1991_s10 }
  0x34   :  { %p1420_p9 = pnand %p1418_p8, %p1415_p7 }
  0x36   :  { %1423 = shalt.err (!%p1420_p9)
}
  0x37   :  { %s1424_s17 = scalar_lea.vmem %s1606_s29, 2048  ;;  %p1429_p11 = scmp.lt.s32.totalorder %s1606_s29, %s1606_s29 }
  0x38   :  { %p1425_p10 = scmp.ne.s32.totalorder %s1606_s29, %s1424_s17  ;;  %p1430_p12 = scmp.lt.s32.totalorder %s1424_s17, %s1424_s17 }
  0x3a   :  { %p1431_p13 = por %p1430_p12, %p1429_p11 }
  0x3c   :  { %p1432_p0 = pnand %p1431_p13, %p1425_p10 }
  0x3e   :  { %1435 = shalt.err (!%p1432_p0)
}
  0x3f   :  { %85 = dma.hbm_to_vmem [thread:$0]  %s1991_s10, 2048, %s1606_s29, [#allocation8], %s1491_s2, %s1491_s2, %s1492_s19  }
  0x40   :  { %s1496_s18 = smov [#allocation10]   ;;  %s1436_s22 = scalar_lea.hbm %s1995_s14, 4096 }
  0x41   :  { %s97_s20 = sshll.u32 %s1496_s18, 4  ;;  %p1437_p1 = scmp.ne.s32.totalorder %s1995_s14, %s1436_s22  ;;  %s98_s20 = int_to_ptr.vmem [resolvable:$true] %s97_s20 }
  0x42   :  { %p1440_p2 = scmp.lt.u32.totalorder %s1436_s22, %s1995_s14 }
  0x44   :  { %p1442_p3 = pnand %p1440_p2, %p1437_p1 }
  0x46   :  { %1445 = shalt.err (!%p1442_p3)
}
  0x47   :  { %s1446_s0 = scalar_lea.vmem %s98_s20, 4096  ;;  %p1451_p5 = scmp.lt.s32.totalorder %s98_s20, %s98_s20 }
  0x48   :  { %p1447_p4 = scmp.ne.s32.totalorder %s98_s20, %s1446_s0  ;;  %p1452_p6 = scmp.lt.s32.totalorder %s1446_s0, %s1446_s0 }
  0x4a   :  { %p1453_p7 = por %p1452_p6, %p1451_p5 }
  0x4c   :  { %p1454_p8 = pnand %p1453_p7, %p1447_p4 }
  0x4e   :  { %1457 = shalt.err (!%p1454_p8)
}
  0x4f   :  { %103 = dma.hbm_to_vmem [thread:$0]  %s1995_s14, 4096, %s98_s20, [#allocation11], %s1491_s2, %s1491_s2, %s1492_s19  }
  0x50   :  { %1480 = dma.done.wait [#allocation5], 16  }
  0x51   :  { %1481 = vsyncadd [#allocation5], 4294967280 }
  0x52   :  { %1482 = dma.done.wait [#allocation3], 2048  }
  0x53   :  { %1483 = vsyncadd [#allocation3], 4294965248 }
  0x54   :  { %1484 = dma.done.wait [#allocation8], 4096  }
  0x55   :  { %1485 = vsyncadd [#allocation8], 4294963200 }
  0x56   :  { %1486 = dma.done.wait [#allocation11], 4096  }
  0x57   :  { %1487 = vsyncadd [#allocation11], 4294963200 }
  0x58   :  { %121 = sfence }
  0x59   :  { %v1658_v0 = vld [vmem:[#allocation6] sm:$0xff]  ;;  %v458_v2 = vld [vmem:[#allocation7 + $0x8] sm:$0xff]  ;;  %v1497_v3 = vmov 0.0|0.0   ;;  %v1662_v5 = vld [vmem:[#allocation6 + $0x10] sm:$0xff]  ;;  %vm1498_vm0 = vmmov 0   ;;  %v1499_v9 = vmov 0.0   ;;  %v122_v44 = vlaneseq }
  0x5a   :  { %v457_v1 = vld [vmem:[#allocation7] sm:$0xff]  ;;  %143 = vadd.xlane.f32.xlu0 %v1658_v0  ;;  %1212 = vmatprep.subr.bf16.mxu1 %v1497_v3  ;;  %v459_v6 = vld [vmem:[#allocation7 + $0x10] sm:$0xff]  ;;  %v1665_v7 = vld [vmem:[#allocation6 + $0x8] sm:$0xff]  ;;  %s1999_s19 = sld [smem:[#allocation18_spill]]  ;;  %v1500_v43 = vmov 0   ;;  %s550_s17 = sld [smem:[#allocation2]] }
  0x5b   :  { %v1213_v4 = vpack.c.bf16 %v458_v2, %v457_v1  ;;  %147 = vadd.xlane.f32.xlu1 %v1662_v5  ;;  %v460_v8 = vld [vmem:[#allocation7 + $0x18] sm:$0xff]  ;;  %1080 = vmatprep.mubr.msk.f32.mxu1 %vm1498_vm0, %v1499_v9  ;;  %v461_v12 = vld [vmem:[#allocation7 + $0x20] sm:$0xff]  ;;  %v462_v13 = vld [vmem:[#allocation7 + $0x28] sm:$0xff]  ;;  %v1725_v45 = vand.u32 127, %v122_v44  ;;  %s927_s30 = sld [smem:[#allocation2 + $0x2]] }
  0x5c   :  { %v1216_v10 = vpack.c.bf16 %v460_v8, %v459_v6  ;;  %v1669_v11 = vld [vmem:[#allocation6 + $0x18] sm:$0xff]  ;;  %1188 = vmatprep.subr.bf16.mxu0 %v1497_v3  ;;  %1045 = vmatprep.mubr.msk.f32.mxu0 %vm1498_vm0, %v1499_v9  ;;  %v1677_v14 = vld [vmem:[#allocation6 + $0x20] sm:$0xff]  ;;  %v1219_v15 = vpack.c.bf16 %v462_v13, %v461_v12  ;;  %v1679_v16 = vld [vmem:[#allocation6 + $0x28] sm:$0xff] }
  0x5d   :  { %1214 = vmatpush3.bf16.msra.mxu1 %v1213_v4  ;;  %v463_v17 = vld [vmem:[#allocation7 + $0x30] sm:$0xff]  ;;  %v464_v18 = vld [vmem:[#allocation7 + $0x38] sm:$0xff]  ;;  %v465_v22 = vld [vmem:[#allocation7 + $0x40] sm:$0xff]  ;;  %1321 = vset.pattern.permute.xlu0 %v1500_v43  ;;  %vm124_vm1 = vcmp.lt.s32.totalorder %v1725_v45, 32 }
  0x5e   :  { %1215 = vmatprep.subr.bf16.mxu1 %v1497_v3  ;;  %145 = vadd.xlane.f32.xlu0 %v1665_v7  ;;  %v1684_v19 = vld [vmem:[#allocation6 + $0x30] sm:$0xff]  ;;  %v1222_v20 = vpack.c.bf16 %v464_v18, %v463_v17  ;;  %v1686_v21 = vld [vmem:[#allocation6 + $0x38] sm:$0xff]  ;;  %v466_v23 = vld [vmem:[#allocation7 + $0x48] sm:$0xff] }
  0x5f   :  { %149 = vadd.xlane.f32.xlu1 %v1669_v11  ;;  %v1691_v24 = vld [vmem:[#allocation6 + $0x40] sm:$0xff]  ;;  %v1225_v25 = vpack.c.bf16 %v466_v23, %v465_v22  ;;  %v1693_v26 = vld [vmem:[#allocation6 + $0x48] sm:$0xff]  ;;  %v467_v27 = vld [vmem:[#allocation7 + $0x50] sm:$0xff] }
  0x60   :  { %v468_v28 = vld [vmem:[#allocation7 + $0x58] sm:$0xff]  ;;  %v1698_v29 = vld [vmem:[#allocation6 + $0x50] sm:$0xff]  ;;  %v469_v32 = vld [vmem:[#allocation7 + $0x60] sm:$0xff] }
  0x61   :  { %1217 = vmatpush3.bf16.msra.mxu1 %v1216_v10  ;;  %v1228_v30 = vpack.c.bf16 %v468_v28, %v467_v27  ;;  %v1700_v31 = vld [vmem:[#allocation6 + $0x58] sm:$0xff]  ;;  %v470_v33 = vld [vmem:[#allocation7 + $0x68] sm:$0xff]  ;;  %v1705_v34 = vld [vmem:[#allocation6 + $0x60] sm:$0xff] }
  0x62   :  { %1218 = vmatprep.subr.bf16.mxu1 %v1497_v3  ;;  %151 = vadd.xlane.f32.xlu0 %v1677_v14  ;;  %v1231_v35 = vpack.c.bf16 %v470_v33, %v469_v32  ;;  %v1707_v36 = vld [vmem:[#allocation6 + $0x68] sm:$0xff]  ;;  %v471_v37 = vld [vmem:[#allocation7 + $0x70] sm:$0xff]  ;;  %v472_v38 = vld [vmem:[#allocation7 + $0x78] sm:$0xff] }
  0x63   :  { %153 = vadd.xlane.f32.xlu1 %v1679_v16  ;;  %v1712_v39 = vld [vmem:[#allocation6 + $0x70] sm:$0xff]  ;;  %v1234_v40 = vpack.c.bf16 %v472_v38, %v471_v37  ;;  %v1714_v41 = vld [vmem:[#allocation6 + $0x78] sm:$0xff]  ;;  %v456_v42 = vld [vmem:[%s1999_s19] sm:$0xff] }
  0x65   :  { %1220 = vmatpush3.bf16.msra.mxu1 %v1219_v15 }
  0x66   :  { %1221 = vmatprep.subr.bf16.mxu1 %v1497_v3  ;;  %155 = vadd.xlane.f32.xlu0 %v1684_v19 }
  0x67   :  { %157 = vadd.xlane.f32.xlu1 %v1686_v21 }
  0x69   :  { %1223 = vmatpush3.bf16.msra.mxu1 %v1222_v20 }
  0x6a   :  { %1224 = vmatprep.subr.bf16.mxu1 %v1497_v3  ;;  %159 = vadd.xlane.f32.xlu0 %v1691_v24 }
  0x6b   :  { %161 = vadd.xlane.f32.xlu1 %v1693_v26 }
  0x6d   :  { %1226 = vmatpush3.bf16.msra.mxu1 %v1225_v25 }
  0x6e   :  { %1227 = vmatprep.subr.bf16.mxu1 %v1497_v3  ;;  %163 = vadd.xlane.f32.xlu0 %v1698_v29 }
  0x6f   :  { %165 = vadd.xlane.f32.xlu1 %v1700_v31 }
  0x71   :  { %1229 = vmatpush3.bf16.msra.mxu1 %v1228_v30 }
  0x72   :  { %1230 = vmatprep.subr.bf16.mxu1 %v1497_v3  ;;  %167 = vadd.xlane.f32.xlu0 %v1705_v34 }
  0x73   :  { %169 = vadd.xlane.f32.xlu1 %v1707_v36 }
  0x75   :  { %1232 = vmatpush3.bf16.msra.mxu1 %v1231_v35 }
  0x76   :  { %1233 = vmatprep.subr.bf16.mxu1 %v1497_v3  ;;  %171 = vadd.xlane.f32.xlu0 %v1712_v39 }
  0x77   :  { %173 = vadd.xlane.f32.xlu1 %v1714_v41 }
  0x79   :  { %1235 = vmatpush3.bf16.msra.mxu1 %v1234_v40 }
  0x7a   :  { %1260 = vmatprep.subr.bf16.mxu1 %v1497_v3 }
  0x7c   :  { %1081 = vmatmul.mubr.f32.vlgmr.msra.gmra.mrb[0].mxu1 %v456_v42 }
  0x7d   :  { %1150 = vmatprep.mubr.msk.f32.mxu1 %vm1498_vm0, %v1499_v9 }
  0xe7   :  { %v144_v46 = vpop.xlane.xlu0 %143 }
  0xe8   :  { %v175_v47 = vmul.f32 0.03125, %v144_v46  ;;  %v148_v48 = vpop.xlane.xlu1 %147 }
  0xe9   :  { %v177_v49 = vmul.f32 0.03125, %v148_v48 }
  0xea   :  { %v191_v50 = vsub.f32 %v1658_v0, %v175_v47 }
  0xeb   :  { %v193_v51 = vsub.f32 %v1662_v5, %v177_v49  ;;  %v146_v52 = vpop.xlane.xlu0 %145 }
  0xec   :  { %v176_v53 = vmul.f32 0.03125, %v146_v52  ;;  %v150_v54 = vpop.xlane.xlu1 %149  ;;  %v1732_v55 = vsel %vm124_vm1, %v191_v50, 0.0 }
  0xed   :  { %v178_v56 = vmul.f32 0.03125, %v150_v54  ;;  %v223_v57 = vmul.f32 %v1732_v55, %v1732_v55  ;;  %v1738_v58 = vsel %vm124_vm1, %v193_v51, 0.0 }
  0xee   :  { %v192_v59 = vsub.f32 %v1665_v7, %v176_v53  ;;  %v225_v62 = vmul.f32 %v1738_v58, %v1738_v58 }
  0xef   :  { %v194_v60 = vsub.f32 %v1669_v11, %v178_v56  ;;  %v152_v61 = vpop.xlane.xlu0 %151  ;;  %239 = vadd.xlane.f32.xlu0 %v223_v57 }
  0xf0   :  { %v179_v63 = vmul.f32 0.03125, %v152_v61  ;;  %v154_v0 = vpop.xlane.xlu1 %153  ;;  %v1746_v1 = vsel %vm124_vm1, %v192_v59, 0.0 }
  0xf1   :  { %v180_v2 = vmul.f32 0.03125, %v154_v0  ;;  %v224_v4 = vmul.f32 %v1746_v1, %v1746_v1  ;;  %v1752_v5 = vsel %vm124_vm1, %v194_v60, 0.0 }
  0xf2   :  { %v195_v6 = vsub.f32 %v1677_v14, %v179_v63  ;;  %v226_v10 = vmul.f32 %v1752_v5, %v1752_v5 }
  0xf3   :  { %v196_v7 = vsub.f32 %v1679_v16, %v180_v2  ;;  %v156_v8 = vpop.xlane.xlu0 %155  ;;  %241 = vadd.xlane.f32.xlu1 %v224_v4  ;;  %243 = vadd.xlane.f32.xlu0 %v225_v62 }
  0xf4   :  { %v181_v11 = vmul.f32 0.03125, %v156_v8  ;;  %v158_v12 = vpop.xlane.xlu1 %157  ;;  %v1760_v13 = vsel %vm124_vm1, %v195_v6, 0.0 }
  0xf5   :  { %v182_v15 = vmul.f32 0.03125, %v158_v12  ;;  %v227_v17 = vmul.f32 %v1760_v13, %v1760_v13  ;;  %v1766_v14 = vsel %vm124_vm1, %v196_v7, 0.0  ;;  %v919_v7 = vld [vmem:[%s1988_s7] ss:$0 sm:$0xff] }
  0xf6   :  { %v197_v16 = vsub.f32 %v1684_v19, %v181_v11  ;;  %v228_v22 = vmul.f32 %v1766_v14, %v1766_v14 }
  0xf7   :  { %v198_v18 = vsub.f32 %v1686_v21, %v182_v15  ;;  %v160_v20 = vpop.xlane.xlu0 %159  ;;  %245 = vadd.xlane.f32.xlu1 %v226_v10  ;;  %247 = vadd.xlane.f32.xlu0 %v227_v17  ;;  %v552_v10 = vstv %s550_s17 }
  0xf8   :  { %v183_v23 = vmul.f32 0.03125, %v160_v20  ;;  %v162_v25 = vpop.xlane.xlu1 %161  ;;  %v1774_v27 = vsel %vm124_vm1, %v197_v16, 0.0 }
  0xf9   :  { %v184_v28 = vmul.f32 0.03125, %v162_v25  ;;  %v229_v30 = vmul.f32 %v1774_v27, %v1774_v27  ;;  %v1780_v19 = vsel %vm124_vm1, %v198_v18, 0.0 }
  0xfa   :  { %v199_v21 = vsub.f32 %v1691_v24, %v183_v23  ;;  %v230_v35 = vmul.f32 %v1780_v19, %v1780_v19 }
  0xfb   :  { %v200_v32 = vsub.f32 %v1693_v26, %v184_v28  ;;  %v164_v33 = vpop.xlane.xlu0 %163  ;;  %249 = vadd.xlane.f32.xlu1 %v228_v22  ;;  %251 = vadd.xlane.f32.xlu0 %v229_v30 }
  0xfc   :  { %v185_v37 = vmul.f32 0.03125, %v164_v33  ;;  %v166_v38 = vpop.xlane.xlu1 %165  ;;  %v1788_v40 = vsel %vm124_vm1, %v199_v21, 0.0 }
  0xfd   :  { %v186_v42 = vmul.f32 0.03125, %v166_v38  ;;  %v231_v43 = vmul.f32 %v1788_v40, %v1788_v40  ;;  %v1794_v24 = vsel %vm124_vm1, %v200_v32, 0.0 }
  0xfe   :  { %v201_v26 = vsub.f32 %v1698_v29, %v185_v37  ;;  %v232_v47 = vmul.f32 %v1794_v24, %v1794_v24 }
  0xff   :  { %v202_v44 = vsub.f32 %v1700_v31, %v186_v42  ;;  %v168_v46 = vpop.xlane.xlu0 %167  ;;  %253 = vadd.xlane.f32.xlu1 %v230_v35  ;;  %255 = vadd.xlane.f32.xlu0 %v231_v43 }
 0x100   :  { %v187_v48 = vmul.f32 0.03125, %v168_v46  ;;  %v170_v49 = vpop.xlane.xlu1 %169  ;;  %v1802_v50 = vsel %vm124_vm1, %v201_v26, 0.0 }
 0x101   :  { %v188_v51 = vmul.f32 0.03125, %v170_v49  ;;  %v233_v52 = vmul.f32 %v1802_v50, %v1802_v50  ;;  %v1808_v29 = vsel %vm124_vm1, %v202_v44, 0.0 }
 0x102   :  { %v203_v31 = vsub.f32 %v1705_v34, %v187_v48  ;;  %v234_v56 = vmul.f32 %v1808_v29, %v1808_v29 }
 0x103   :  { %v204_v53 = vsub.f32 %v1707_v36, %v188_v51  ;;  %v172_v54 = vpop.xlane.xlu0 %171  ;;  %257 = vadd.xlane.f32.xlu1 %v232_v47  ;;  %259 = vadd.xlane.f32.xlu0 %v233_v52 }
 0x104   :  { %v189_v57 = vmul.f32 0.03125, %v172_v54  ;;  %v174_v59 = vpop.xlane.xlu1 %173  ;;  %v1816_v60 = vsel %vm124_vm1, %v203_v31, 0.0 }
 0x105   :  { %v190_v61 = vmul.f32 0.03125, %v174_v59  ;;  %v235_v62 = vmul.f32 %v1816_v60, %v1816_v60  ;;  %v1822_v34 = vsel %vm124_vm1, %v204_v53, 0.0 }
 0x106   :  { %v205_v36 = vsub.f32 %v1712_v39, %v189_v57  ;;  %v236_v0 = vmul.f32 %v1822_v34, %v1822_v34 }
 0x107   :  { %v206_v63 = vsub.f32 %v1714_v41, %v190_v61  ;;  %261 = vadd.xlane.f32.xlu1 %v234_v56  ;;  %263 = vadd.xlane.f32.xlu0 %v235_v62  ;;  %v379_v41 = vld [vmem:[%s1982_s1] sm:$0xff] }
 0x108   :  { %v1830_v2 = vsel %vm124_vm1, %v205_v36, 0.0  ;;  %v1853_v56 = vld [vmem:[%s1985_s4] ss:$0 sm:$0xff] }
 0x109   :  { %v237_v4 = vmul.f32 %v1830_v2, %v1830_v2  ;;  %v1836_v6 = vsel %vm124_vm1, %v206_v63, 0.0 }
 0x10a   :  { %v238_v39 = vmul.f32 %v1836_v6, %v1836_v6 }
 0x10b   :  { %265 = vadd.xlane.f32.xlu1 %v236_v0  ;;  %267 = vadd.xlane.f32.xlu0 %v237_v4 }
 0x10f   :  { %269 = vadd.xlane.f32.xlu1 %v238_v39 }
 0x121   :  { %381 = vperm.xlu0 %1321, %v379_v41   ;;  %v1860_v41 = vld [vmem:[%s1986_s5] ss:$0 sm:$0xff] }
 0x14f   :  { %v546_v8 = vpop.f32.mrb[0].mxu1 }
 0x150   :  { %v547_v11 = vadd.f32 %v919_v7, %v546_v8  ;;  %v1082_v12 = vpop.f32.mrb[1].mxu1 }
 0x152   :  { %vm551_vm2 = vcmp.gt.f32.partialorder %v547_v11, 0.0  ;;  %v553_v15 = vmul.f32 %v552_v10, %v547_v11 }
 0x154   :  { %v1846_v17 = vsel %vm551_vm2, %v547_v11, %v553_v15 }
 0x155   :  { %557 = vadd.xlane.f32.xlu1 %v1846_v17 }
 0x17c   :  { %v240_v16 = vpop.xlane.xlu0 %239 }
 0x17d   :  { %v271_v18 = vmul.f32 0.03125, %v240_v16 }
 0x17f   :  { %v287_v20 = vadd.f32 1e-05, %v271_v18 }
 0x180   :  { %v242_v22 = vpop.xlane.xlu1 %241  ;;  %v244_v23 = vpop.xlane.xlu0 %243 }
 0x181   :  { %1322 = vrsqrt.f32 %v287_v20  ;;  %v272_v25 = vmul.f32 0.03125, %v242_v22  ;;  %v273_v28 = vmul.f32 0.03125, %v244_v23 }
 0x183   :  { %v288_v30 = vadd.f32 1e-05, %v272_v25  ;;  %v289_v21 = vadd.f32 1e-05, %v273_v28 }
 0x184   :  { %v246_v32 = vpop.xlane.xlu1 %245  ;;  %v248_v33 = vpop.xlane.xlu0 %247 }
 0x185   :  { %1324 = vrsqrt.f32 %v288_v30  ;;  %v274_v35 = vmul.f32 0.03125, %v246_v32  ;;  %v275_v37 = vmul.f32 0.03125, %v248_v33 }
 0x186   :  { %1326 = vrsqrt.f32 %v289_v21 }
 0x187   :  { %v290_v38 = vadd.f32 1e-05, %v274_v35  ;;  %v291_v42 = vadd.f32 1e-05, %v275_v37 }
 0x188   :  { %v250_v43 = vpop.xlane.xlu1 %249  ;;  %v252_v26 = vpop.xlane.xlu0 %251 }
 0x189   :  { %1328 = vrsqrt.f32 %v290_v38  ;;  %v276_v44 = vmul.f32 0.03125, %v250_v43  ;;  %v277_v46 = vmul.f32 0.03125, %v252_v26 }
 0x18a   :  { %1330 = vrsqrt.f32 %v291_v42 }
 0x18b   :  { %v1323_v47 = vpop.eup %1322  ;;  %v292_v48 = vadd.f32 1e-05, %v276_v44  ;;  %v293_v49 = vadd.f32 1e-05, %v277_v46 }
 0x18c   :  { %v254_v51 = vpop.xlane.xlu1 %253  ;;  %v256_v52 = vpop.xlane.xlu0 %255  ;;  %v319_v31 = vmul.f32 %v1323_v47, %v1732_v55 }
 0x18d   :  { %1332 = vrsqrt.f32 %v292_v48  ;;  %v278_v53 = vmul.f32 0.03125, %v254_v51  ;;  %v279_v54 = vmul.f32 0.03125, %v256_v52 }
 0x18e   :  { %1334 = vrsqrt.f32 %v293_v49  ;;  %v341_v4 = vmul.f32 %v1853_v56, %v319_v31 }
 0x18f   :  { %v1325_v57 = vpop.eup %1324  ;;  %v294_v59 = vadd.f32 1e-05, %v278_v53  ;;  %v295_v61 = vadd.f32 1e-05, %v279_v54 }
 0x190   :  { %v1327_v62 = vpop.eup %1326  ;;  %v258_v36 = vpop.xlane.xlu1 %257  ;;  %v320_v0 = vmul.f32 %v1325_v57, %v1746_v1  ;;  %v363_v18 = vadd.f32 %v1860_v41, %v341_v4 }
 0x191   :  { %v260_v63 = vpop.xlane.xlu0 %259  ;;  %1336 = vrsqrt.f32 %v294_v59  ;;  %v280_v55 = vmul.f32 0.03125, %v258_v36  ;;  %v321_v7 = vmul.f32 %v1327_v62, %v1738_v58 }
 0x192   :  { %v281_v39 = vmul.f32 0.03125, %v260_v63  ;;  %1338 = vrsqrt.f32 %v295_v61  ;;  %v342_v8 = vmul.f32 %v1853_v56, %v320_v0 }
 0x193   :  { %v1329_v10 = vpop.eup %1328  ;;  %v296_v11 = vadd.f32 1e-05, %v280_v55  ;;  %v343_v23 = vmul.f32 %v1853_v56, %v321_v7 }
 0x194   :  { %v297_v12 = vadd.f32 1e-05, %v281_v39  ;;  %v1331_v15 = vpop.eup %1330  ;;  %v262_v1 = vpop.xlane.xlu1 %261  ;;  %v364_v20 = vadd.f32 %v1860_v41, %v342_v8  ;;  %v322_v22 = vmul.f32 %v1329_v10, %v1752_v5 }
 0x195   :  { %v264_v16 = vpop.xlane.xlu0 %263  ;;  %1340 = vrsqrt.f32 %v296_v11  ;;  %v282_v25 = vmul.f32 0.03125, %v262_v1  ;;  %v323_v21 = vmul.f32 %v1331_v15, %v1760_v13  ;;  %v365_v5 = vadd.f32 %v1860_v41, %v343_v23 }
 0x196   :  { %v283_v58 = vmul.f32 0.03125, %v264_v16  ;;  %1342 = vrsqrt.f32 %v297_v12  ;;  %v1189_v28 = vpack.c.bf16 %v364_v20, %v363_v18  ;;  %v344_v30 = vmul.f32 %v1853_v56, %v322_v22 }
 0x197   :  { %v1333_v32 = vpop.eup %1332  ;;  %v298_v33 = vadd.f32 1e-05, %v282_v25  ;;  %v345_v44 = vmul.f32 %v1853_v56, %v323_v21 }
 0x198   :  { %v299_v35 = vadd.f32 1e-05, %v283_v58  ;;  %v1335_v37 = vpop.eup %1334  ;;  %v266_v38 = vpop.xlane.xlu1 %265  ;;  %1190 = vmatpush3.bf16.msra.mxu0 %v1189_v28  ;;  %v366_v43 = vadd.f32 %v1860_v41, %v344_v30  ;;  %v324_v26 = vmul.f32 %v1333_v32, %v1766_v14 }
 0x199   :  { %v268_v42 = vpop.xlane.xlu0 %267  ;;  %1344 = vrsqrt.f32 %v298_v33  ;;  %v284_v46 = vmul.f32 0.03125, %v266_v38  ;;  %1191 = vmatprep.subr.bf16.mxu0 %v1497_v3  ;;  %v325_v13 = vmul.f32 %v1335_v37, %v1774_v27  ;;  %v367_v14 = vadd.f32 %v1860_v41, %v345_v44  ;;  %v600_v44 = vld [vmem:[#allocation9] sm:$0xff] }
 0x19a   :  { %v285_v47 = vmul.f32 0.03125, %v268_v42  ;;  %1346 = vrsqrt.f32 %v299_v35  ;;  %v1192_v48 = vpack.c.bf16 %v366_v43, %v365_v5  ;;  %v346_v49 = vmul.f32 %v1853_v56, %v324_v26 }
 0x19b   :  { %v1337_v51 = vpop.eup %1336  ;;  %v300_v52 = vadd.f32 1e-05, %v284_v46  ;;  %v347_v61 = vmul.f32 %v1853_v56, %v325_v13  ;;  %v601_v46 = vld [vmem:[#allocation9 + $0x8] sm:$0xff]  ;;  %v602_v13 = vld [vmem:[#allocation9 + $0x10] sm:$0xff] }
 0x19c   :  { %v301_v31 = vadd.f32 1e-05, %v285_v47  ;;  %v1339_v53 = vpop.eup %1338  ;;  %v270_v54 = vpop.xlane.xlu1 %269  ;;  %1193 = vmatpush3.bf16.msra.mxu0 %v1192_v48  ;;  %v368_v57 = vadd.f32 %v1860_v41, %v346_v49  ;;  %v326_v59 = vmul.f32 %v1337_v51, %v1780_v19  ;;  %v603_v48 = vld [vmem:[#allocation9 + $0x18] sm:$0xff] }
 0x19d   :  { %1348 = vrsqrt.f32 %v300_v52  ;;  %v286_v27 = vmul.f32 0.03125, %v270_v54  ;;  %1194 = vmatprep.subr.bf16.mxu0 %v1497_v3  ;;  %v327_v62 = vmul.f32 %v1339_v53, %v1788_v40  ;;  %v369_v39 = vadd.f32 %v1860_v41, %v347_v61  ;;  %v604_v54 = vld [vmem:[#allocation9 + $0x20] sm:$0xff]  ;;  %v607_v61 = vld [vmem:[#allocation9 + $0x38] sm:$0xff] }
 0x19e   :  { %1350 = vrsqrt.f32 %v301_v31  ;;  %v1195_v36 = vpack.c.bf16 %v368_v57, %v367_v14  ;;  %v348_v63 = vmul.f32 %v1853_v56, %v326_v59  ;;  %v1240_v49 = vpack.c.bf16 %v603_v48, %v602_v13  ;;  %v605_v14 = vld [vmem:[#allocation9 + $0x28] sm:$0xff]  ;;  %v606_v59 = vld [vmem:[#allocation9 + $0x30] sm:$0xff]  ;;  %v922_v48 = vld [vmem:[%s1992_s11] ss:$0 sm:$0xff] }
 0x19f   :  { %v1341_v0 = vpop.eup %1340  ;;  %v302_v4 = vadd.f32 1e-05, %v286_v27  ;;  %v349_v8 = vmul.f32 %v1853_v56, %v327_v62  ;;  %v1243_v57 = vpack.c.bf16 %v605_v14, %v604_v54  ;;  %v1246_v27 = vpack.c.bf16 %v607_v61, %v606_v59  ;;  %v608_v62 = vld [vmem:[#allocation9 + $0x40] sm:$0xff]  ;;  %v728_v54 = vld [vmem:[#allocation10 + $0x88] sm:$0xff]  ;;  %v729_v14 = vld [vmem:[#allocation10 + $0x90] sm:$0xff] }
 0x1a0   :  { %v1343_v55 = vpop.eup %1342  ;;  %1196 = vmatpush3.bf16.msra.mxu0 %v1195_v36  ;;  %v370_v19 = vadd.f32 %v1860_v41, %v348_v63  ;;  %v328_v7 = vmul.f32 %v1341_v0, %v1794_v24  ;;  %v382_v26 = vpop.permute.xlu0 %381  ;;  %v609_v36 = vld [vmem:[#allocation9 + $0x48] sm:$0xff]  ;;  %v611_v0 = vld [vmem:[#allocation9 + $0x58] sm:$0xff] }
 0x1a1   :  { %1352 = vrsqrt.f32 %v302_v4  ;;  %1197 = vmatprep.subr.bf16.mxu0 %v1497_v3  ;;  %v329_v40 = vmul.f32 %v1343_v55, %v1802_v50  ;;  %v371_v1 = vadd.f32 %v1860_v41, %v349_v8  ;;  %vm383_vm3 = vcmp.eq.s32.totalorder %v382_v26, %v1725_v45  ;;  %v612_v55 = vld [vmem:[#allocation9 + $0x60] sm:$0xff]  ;;  %v615_v8 = vld [vmem:[#allocation9 + $0x78] sm:$0xff]  ;;  %v737_v45 = vld [vmem:[#allocation10 + $0xd0] sm:$0xff] }
 0x1a2   :  { %v1198_v10 = vpack.c.bf16 %v370_v19, %v369_v39  ;;  %v350_v11 = vmul.f32 %v1853_v56, %v328_v7  ;;  %v1249_v63 = vpack.c.bf16 %v609_v36, %v608_v62  ;;  %v613_v39 = vld [vmem:[#allocation9 + $0x68] sm:$0xff]  ;;  %v614_v7 = vld [vmem:[#allocation9 + $0x70] sm:$0xff]  ;;  %v596_v26 = vld [vmem:[#allocation10 + $0x60] sm:$0xff] }
 0x1a3   :  { %v1345_v12 = vpop.eup %1344  ;;  %v351_v24 = vmul.f32 %v1853_v56, %v329_v40  ;;  %v1255_v19 = vpack.c.bf16 %v613_v39, %v612_v55  ;;  %v1258_v40 = vpack.c.bf16 %v615_v8, %v614_v7  ;;  %v730_v59 = vld [vmem:[#allocation10 + $0x98] sm:$0xff]  ;;  %v731_v55 = vld [vmem:[#allocation10 + $0xa0] sm:$0xff]  ;;  %v732_v39 = vld [vmem:[#allocation10 + $0xa8] sm:$0xff] }
 0x1a4   :  { %v1347_v15 = vpop.eup %1346  ;;  %1199 = vmatpush3.bf16.msra.mxu0 %v1198_v10  ;;  %v372_v16 = vadd.f32 %v1860_v41, %v350_v11  ;;  %v330_v18 = vmul.f32 %v1345_v12, %v1808_v29  ;;  %v1264_v61 = vpack.c.bf16 %v730_v59, %v729_v14  ;;  %v733_v7 = vld [vmem:[#allocation10 + $0xb0] sm:$0xff]  ;;  %v734_v8 = vld [vmem:[#allocation10 + $0xb8] sm:$0xff] }
 0x1a5   :  { %1200 = vmatprep.subr.bf16.mxu0 %v1497_v3  ;;  %v331_v20 = vmul.f32 %v1347_v15, %v1816_v60  ;;  %v373_v58 = vadd.f32 %v1860_v41, %v351_v24 }
 0x1a6   :  { %v1201_v22 = vpack.c.bf16 %v372_v16, %v371_v1  ;;  %v352_v50 = vmul.f32 %v1853_v56, %v330_v18  ;;  %v920_v1 = vld [vmem:[%s1989_s8] ss:$0 sm:$0xff]  ;;  %s923_s8 = sld [smem:[#allocation2 + $0x1]] }
 0x1a7   :  { %v1349_v23 = vpop.eup %1348  ;;  %v353_v29 = vmul.f32 %v1853_v56, %v331_v20  ;;  %v921_v18 = vld [vmem:[%s1990_s9] ss:$0 sm:$0xff] }
 0x1a8   :  { %v1351_v25 = vpop.eup %1350  ;;  %1202 = vmatpush3.bf16.msra.mxu0 %v1201_v22  ;;  %v374_v28 = vadd.f32 %v1860_v41, %v352_v50  ;;  %v332_v30 = vmul.f32 %v1349_v23, %v1822_v34  ;;  %v584_v20 = vld [vmem:[#allocation10] sm:$0xff]  ;;  %v585_v22 = vld [vmem:[#allocation10 + $0x8] sm:$0xff] }
 0x1a9   :  { %1203 = vmatprep.subr.bf16.mxu0 %v1497_v3  ;;  %v333_v21 = vmul.f32 %v1351_v25, %v1830_v2  ;;  %v375_v35 = vadd.f32 %v1860_v41, %v353_v29  ;;  %v587_v29 = vld [vmem:[#allocation10 + $0x18] sm:$0xff] }
 0x1aa   :  { %v1204_v32 = vpack.c.bf16 %v374_v28, %v373_v58  ;;  %v354_v60 = vmul.f32 %v1853_v56, %v332_v30  ;;  %v1285_v58 = vpack.c.bf16 %v585_v22, %v584_v20  ;;  %v586_v30 = vld [vmem:[#allocation10 + $0x10] sm:$0xff]  ;;  %v742_v22 = vld [vmem:[#allocation10 + $0xf8] sm:$0xff] }
 0x1ab   :  { %v1353_v33 = vpop.eup %1352  ;;  %v355_v42 = vmul.f32 %v1853_v56, %v333_v21  ;;  %v1288_v21 = vpack.c.bf16 %v587_v29, %v586_v30  ;;  %v924_v29 = vld [vmem:[%s1993_s12] ss:$0 sm:$0xff]  ;;  %s1502_s12 = smov [#allocation12]  }
 0x1ac   :  { %1205 = vmatpush3.bf16.msra.mxu0 %v1204_v32  ;;  %v376_v37 = vadd.f32 %v1860_v41, %v354_v60  ;;  %v334_v38 = vmul.f32 %v1353_v33, %v1836_v6  ;;  %v1237_v6 = vpack.c.bf16 %v601_v46, %v600_v44  ;;  %v588_v32 = vld [vmem:[#allocation10 + $0x20] sm:$0xff]  ;;  %v589_v60 = vld [vmem:[#allocation10 + $0x28] sm:$0xff]  ;;  %s903_s29 = sshll.u32 %s1502_s12, 4  ;;  %s904_s29 = int_to_ptr.vmem [resolvable:$true] %s903_s29 }
 0x1ad   :  { %1206 = vmatprep.subr.bf16.mxu0 %v1497_v3  ;;  %v377_v2 = vadd.f32 %v1860_v41, %v355_v42  ;;  %v1291_v33 = vpack.c.bf16 %v589_v60, %v588_v32  ;;  %v592_v42 = vld [vmem:[#allocation10 + $0x40] sm:$0xff]  ;;  %v597_v44 = vld [vmem:[#allocation10 + $0x68] sm:$0xff]  ;;  %p1463_p10 = scmp.lt.s32.totalorder %s904_s29, %s904_s29 }
 0x1ae   :  { %v1207_v34 = vpack.c.bf16 %v376_v37, %v375_v35  ;;  %v356_v5 = vmul.f32 %v1853_v56, %v334_v38  ;;  %v1501_v56 = vmov 1.0   ;;  %v590_v35 = vld [vmem:[#allocation10 + $0x30] sm:$0xff]  ;;  %v591_v37 = vld [vmem:[#allocation10 + $0x38] sm:$0xff]  ;;  %v1303_v46 = vpack.c.bf16 %v597_v44, %v596_v26  ;;  %v925_v32 = vld [vmem:[%s1994_s13] ss:$0 sm:$0xff]  ;;  %s1458_s13 = scalar_lea.vmem %s904_s29, 128 }
 0x1af   :  { %v1294_v38 = vpack.c.bf16 %v591_v37, %v590_v35  ;;  %v926_v37 = vld [vmem:[%s1996_s15] ss:$0 sm:$0xff]  ;;  %p1459_p9 = scmp.ne.s32.totalorder %s904_s29, %s1458_s13  ;;  %p1464_p11 = scmp.lt.s32.totalorder %s1458_s13, %s1458_s13 }
 0x1b0   :  { %1208 = vmatpush3.bf16.msra.mxu0 %v1207_v34  ;;  %v378_v43 = vadd.f32 %v1860_v41, %v356_v5  ;;  %v593_v34 = vld [vmem:[#allocation10 + $0x48] sm:$0xff] }
 0x1b1   :  { %1209 = vmatprep.subr.bf16.mxu0 %v1497_v3  ;;  %v1297_v5 = vpack.c.bf16 %v593_v34, %v592_v42  ;;  %v893_v34 = vstv %s927_s30  ;;  %p1465_p12 = por %p1464_p11, %p1463_p10 }
 0x1b2   :  { %v1210_v47 = vpack.c.bf16 %v378_v43, %v377_v2  ;;  %v595_v2 = vld [vmem:[#allocation10 + $0x58] sm:$0xff] }
 0x1b3   :  { %p1466_p13 = pnand %p1465_p12, %p1459_p9 }
 0x1b4   :  { %1211 = vmatpush3.bf16.msra.mxu0 %v1210_v47  ;;  %v598_v47 = vld [vmem:[#allocation10 + $0x70] sm:$0xff] }
 0x1b5   :  { %1236 = vmatprep.subr.bf16.mxu0 %v1497_v3 }
 0x1b7   :  { %1046 = vmatmul.mubr.msk.f32.vlgmr.msra.gmra.mrb[0].mxu0 %vm383_vm3, %v1501_v56 }
 0x1b8   :  { %1238 = vmatpush3.bf16.msra.mxu0 %v1237_v6  ;;  %1115 = vmatprep.mubr.msk.f32.mxu0 %vm1498_vm0, %v1499_v9  ;;  %v599_v6 = vld [vmem:[#allocation10 + $0x78] sm:$0xff] }
 0x1b9   :  { %1239 = vmatprep.subr.bf16.mxu0 %v1497_v3  ;;  %v1306_v13 = vpack.c.bf16 %v599_v6, %v598_v47 }
 0x1bc   :  { %1241 = vmatpush3.bf16.msra.mxu0 %v1240_v49  ;;  %v695_v49 = vstv %s923_s8 }
 0x1bd   :  { %1242 = vmatprep.subr.bf16.mxu0 %v1497_v3 }
 0x1c0   :  { %1244 = vmatpush3.bf16.msra.mxu0 %v1243_v57 }
 0x1c1   :  { %1245 = vmatprep.subr.bf16.mxu0 %v1497_v3 }
 0x1c4   :  { %1247 = vmatpush3.bf16.msra.mxu0 %v1246_v27 }
 0x1c5   :  { %1248 = vmatprep.subr.bf16.mxu0 %v1497_v3 }
 0x1c8   :  { %1250 = vmatpush3.bf16.msra.mxu0 %v1249_v63 }
 0x1c9   :  { %1251 = vmatprep.subr.bf16.mxu0 %v1497_v3 }
 0x1e2   :  { %v558_v41 = vpop.xlane.xlu1 %557 }
 0x1e3   :  { %v559_v51 = vmul.f32 0.03125, %v558_v41 }
 0x1e5   :  { %v560_v52 = vsub.f32 %v1846_v17, %v559_v51  ;;  %v610_v17 = vld [vmem:[#allocation9 + $0x50] sm:$0xff] }
 0x1e6   :  { %v1252_v4 = vpack.c.bf16 %v611_v0, %v610_v17 }
 0x1e7   :  { %v561_v31 = vsel %vm124_vm1, %v560_v52, 0.0 }
 0x1e8   :  { %v562_v53 = vmul.f32 %v561_v31, %v561_v31  ;;  %1253 = vmatpush3.bf16.msra.mxu0 %v1252_v4 }
 0x1e9   :  { %1254 = vmatprep.subr.bf16.mxu0 %v1497_v3 }
 0x1ea   :  { %563 = vadd.xlane.f32.xlu1 %v562_v53  ;;  %v727_v53 = vld [vmem:[#allocation10 + $0x80] sm:$0xff] }
 0x1eb   :  { %v1261_v57 = vpack.c.bf16 %v728_v54, %v727_v53 }
 0x1ec   :  { %1256 = vmatpush3.bf16.msra.mxu0 %v1255_v19  ;;  %v1267_v19 = vpack.c.bf16 %v732_v39, %v731_v55 }
 0x1ed   :  { %1257 = vmatprep.subr.bf16.mxu0 %v1497_v3  ;;  %1262 = vmatpush3.bf16.msra.mxu1 %v1261_v57 }
 0x1ee   :  { %1263 = vmatprep.subr.bf16.mxu1 %v1497_v3 }
 0x1f0   :  { %1259 = vmatpush3.bf16.msra.mxu0 %v1258_v40  ;;  %v1270_v40 = vpack.c.bf16 %v734_v8, %v733_v7 }
 0x1f1   :  { %1284 = vmatprep.subr.bf16.mxu0 %v1497_v3  ;;  %1265 = vmatpush3.bf16.msra.mxu1 %v1264_v61 }
 0x1f2   :  { %1266 = vmatprep.subr.bf16.mxu1 %v1497_v3 }
 0x1f5   :  { %1268 = vmatpush3.bf16.msra.mxu1 %v1267_v19 }
 0x1f6   :  { %1269 = vmatprep.subr.bf16.mxu1 %v1497_v3 }
 0x1f9   :  { %1271 = vmatpush3.bf16.msra.mxu1 %v1270_v40 }
 0x1fa   :  { %1272 = vmatprep.subr.bf16.mxu1 %v1497_v3 }
 0x277   :  { %v564_v10 = vpop.xlane.xlu1 %563 }
 0x278   :  { %v565_v11 = vmul.f32 0.03125, %v564_v10  ;;  %v735_v10 = vld [vmem:[#allocation10 + $0xc0] sm:$0xff] }
 0x27a   :  { %v566_v12 = vadd.f32 1e-05, %v565_v11  ;;  %v736_v11 = vld [vmem:[#allocation10 + $0xc8] sm:$0xff] }
 0x27c   :  { %1354 = vrsqrt.f32 %v566_v12  ;;  %v1273_v12 = vpack.c.bf16 %v736_v11, %v735_v10 }
 0x27e   :  { %1274 = vmatpush3.bf16.msra.mxu1 %v1273_v12 }
 0x27f   :  { %1275 = vmatprep.subr.bf16.mxu1 %v1497_v3 }
 0x286   :  { %v1355_v15 = vpop.eup %1354 }
 0x287   :  { %v568_v16 = vmul.f32 %v1355_v15, %v561_v31  ;;  %v738_v15 = vld [vmem:[#allocation10 + $0xd8] sm:$0xff] }
 0x289   :  { %v575_v24 = vmul.f32 %v920_v1, %v568_v16  ;;  %v1276_v1 = vpack.c.bf16 %v738_v15, %v737_v45  ;;  %v739_v16 = vld [vmem:[#allocation10 + $0xe0] sm:$0xff] }
 0x28a   :  { %v1935_v50 = vpop.f32.mrb[0].mxu0 }
 0x28b   :  { %v582_v23 = vadd.f32 %v921_v18, %v575_v24  ;;  %v1047_v25 = vpop.f32.mrb[1].mxu0  ;;  %1277 = vmatpush3.bf16.msra.mxu1 %v1276_v1  ;;  %v740_v18 = vld [vmem:[#allocation10 + $0xe8] sm:$0xff]  ;;  %v741_v24 = vld [vmem:[#allocation10 + $0xf0] sm:$0xff] }
 0x28c   :  { %1278 = vmatprep.subr.bf16.mxu1 %v1497_v3  ;;  %v1279_v20 = vpack.c.bf16 %v740_v18, %v739_v16 }
 0x28d   :  { %v583_v28 = vadd.f32 %v582_v23, %v1935_v50  ;;  %v1282_v23 = vpack.c.bf16 %v742_v22, %v741_v24 }
 0x28f   :  { %1116 = vmatmul.mubr.f32.vlgmr.msra.gmra.mrb[2].mxu0 %v583_v28  ;;  %1280 = vmatpush3.bf16.msra.mxu1 %v1279_v20 }
 0x290   :  { %1286 = vmatpush3.bf16.msra.mxu0 %v1285_v58  ;;  %1185 = vmatprep.mubr.msk.f32.mxu0 %vm1498_vm0, %v1499_v9  ;;  %v594_v9 = vld [vmem:[#allocation10 + $0x50] sm:$0xff] }
 0x291   :  { %1287 = vmatprep.subr.bf16.mxu0 %v1497_v3  ;;  %v1300_v43 = vpack.c.bf16 %v595_v2, %v594_v9  ;;  %1281 = vmatprep.subr.bf16.mxu1 %v1497_v3 }
 0x293   :  { %1283 = vmatpush3.bf16.msra.mxu1 %v1282_v23 }
 0x294   :  { %1289 = vmatpush3.bf16.msra.mxu0 %v1288_v21 }
 0x295   :  { %1290 = vmatprep.subr.bf16.mxu0 %v1497_v3 }
 0x298   :  { %1292 = vmatpush3.bf16.msra.mxu0 %v1291_v33 }
 0x299   :  { %1293 = vmatprep.subr.bf16.mxu0 %v1497_v3 }
 0x29c   :  { %1295 = vmatpush3.bf16.msra.mxu0 %v1294_v38 }
 0x29d   :  { %1296 = vmatprep.subr.bf16.mxu0 %v1497_v3 }
 0x2a0   :  { %1298 = vmatpush3.bf16.msra.mxu0 %v1297_v5 }
 0x2a1   :  { %1299 = vmatprep.subr.bf16.mxu0 %v1497_v3 }
 0x2a4   :  { %1301 = vmatpush3.bf16.msra.mxu0 %v1300_v43 }
 0x2a5   :  { %1302 = vmatprep.subr.bf16.mxu0 %v1497_v3 }
 0x2a8   :  { %1304 = vmatpush3.bf16.msra.mxu0 %v1303_v46 }
 0x2a9   :  { %1305 = vmatprep.subr.bf16.mxu0 %v1497_v3 }
 0x2ac   :  { %1307 = vmatpush3.bf16.msra.mxu0 %v1306_v13 }
 0x2af   :  { %1186 = vmatmul.mubr.f32.vlgmr.msra.gmra.mrb[4].mxu0 %v583_v28 }
 0x362   :  { %v689_v56 = vpop.f32.mrb[2].mxu0 }
 0x363   :  { %v690_v41 = vadd.f32 %v922_v48, %v689_v56  ;;  %v1117_v51 = vpop.f32.mrb[3].mxu0 }
 0x365   :  { %vm694_vm4 = vcmp.gt.f32.partialorder %v690_v41, 0.0  ;;  %v696_v52 = vmul.f32 %v695_v49, %v690_v41 }
 0x367   :  { %v697_v31 = vsel %vm694_vm4, %v690_v41, %v696_v52 }
 0x368   :  { %700 = vadd.xlane.f32.xlu1 %v697_v31 }
 0x382   :  { %v879_v27 = vpop.f32.mrb[4].mxu0 }
 0x383   :  { %v1187_v62 = vpop.f32.mrb[5].mxu0 }
 0x3f5   :  { %v701_v36 = vpop.xlane.xlu1 %700 }
 0x3f6   :  { %v702_v63 = vmul.f32 0.03125, %v701_v36 }
 0x3f8   :  { %v703_v17 = vsub.f32 %v697_v31, %v702_v63 }
 0x3fa   :  { %v704_v0 = vsel %vm124_vm1, %v703_v17, 0.0 }
 0x3fb   :  { %v705_v4 = vmul.f32 %v704_v0, %v704_v0 }
 0x3fd   :  { %706 = vadd.xlane.f32.xlu1 %v705_v4 }
 0x48a   :  { %v707_v25 = vpop.xlane.xlu1 %706 }
 0x48b   :  { %v708_v58 = vmul.f32 0.03125, %v707_v25 }
 0x48d   :  { %v709_v28 = vadd.f32 1e-05, %v708_v58 }
 0x48f   :  { %1356 = vrsqrt.f32 %v709_v28 }
 0x499   :  { %v1357_v30 = vpop.eup %1356 }
 0x49a   :  { %v711_v21 = vmul.f32 %v1357_v30, %v704_v0 }
 0x49c   :  { %v718_v60 = vmul.f32 %v924_v29, %v711_v21 }
 0x49e   :  { %v725_v33 = vadd.f32 %v925_v32, %v718_v60 }
 0x4a0   :  { %v726_v35 = vadd.f32 %v725_v33, %v1935_v50 }
 0x4a2   :  { %1151 = vmatmul.mubr.f32.vlgmr.msra.gmra.mrb[2].mxu1 %v726_v35 }
 0x575   :  { %v809_v3 = vpop.f32.mrb[2].mxu1 }
 0x576   :  { %v880_v38 = vadd.f32 %v879_v27, %v809_v3  ;;  %v1152_v42 = vpop.f32.mrb[3].mxu1 }
 0x578   :  { %v890_v5 = vadd.f32 %v926_v37, %v880_v38 }
 0x57a   :  { %vm892_vm5 = vcmp.gt.f32.partialorder %v890_v5, 0.0  ;;  %v894_v9 = vmul.f32 %v893_v34, %v890_v5 }
 0x57c   :  { %v895_v2 = vsel %vm892_vm5, %v890_v5, %v894_v9 }
 0x57d   :  { %896 = vst [vmem:[#allocation12] sm:$0xff] %v895_v2 }
 0x57e   :  { %1469 = shalt.err (!%p1466_p13)
}
 0x57f   :  { %s1470_s2 = scalar_lea.hbm %s1997_s16, 128 }
 0x580   :  { %p1471_p0 = scmp.ne.s32.totalorder %s1997_s16, %s1470_s2  ;;  %p1474_p1 = scmp.lt.u32.totalorder %s1470_s2, %s1997_s16 }
 0x582   :  { %p1476_p2 = pnand %p1474_p1, %p1471_p0 }
 0x584   :  { %1479 = shalt.err (!%p1476_p2)
}
 0x585   :  { %906 = dma.vmem_to_hbm [thread:$0]  %s904_s29, 128, %s1997_s16, [#allocation4]  }
 0x586   :  { %1488 = dma.done.wait [#allocation4], 128  }
 0x587   :  { %1489 = vsyncadd [#allocation4], 4294967168 }
 0x588   :  { %910 = vsyncpa [#allocation3], 1 }
 0x589   :  { %911 = vsyncpa [#allocation8], 1 }
 0x58a   :  { %912 = vsyncpa [#allocation11], 1 }
 0x58b   :  { %913 = vsyncpa [#allocation4], 1 }
 0x58c   :  { %914 = vsyncpa [#allocation5], 1 }

</bundles_post_ra>
